<compile_context>
chip_gen: v6e
topology: v6e:2x2x1
jax: 0.10.0
libtpu: 0.0.40
codegen_flags: <defaults>
</compile_context>

<pallas_src>
import functools

import jax
import jax.numpy as jnp
from jax.experimental import pallas as pl
from jax.experimental.pallas import tpu as pltpu

LANE = 128  # TPU lane width.


def _round_up(n, m):
    return ((n + m - 1) // m) * m


def mlp_kernel(x_ref, w1_ref, b1_ref, w2_ref, b2_ref, o_ref):
    # fc1: bf16 (B, INp) @ bf16 (INp, H) -> f32 accumulate on the MXU.
    h = jnp.dot(x_ref[...], w1_ref[...], preferred_element_type=jnp.float32)
    # Bias + ReLU in f32 on the VPU (free filler under MXU slack; v5e-safe).
    h = jnp.maximum(h + b1_ref[...], 0.0)
    # fc2: bf16 hidden @ bf16 (H, OUTp) -> f32 accumulate; add padded bias and
    # store lane-dense (OUTp is a multiple of 128 -> unmasked vst).
    y = jnp.dot(h.astype(jnp.bfloat16), w2_ref[...],
                preferred_element_type=jnp.float32)
    o_ref[...] = (y + b2_ref[...]).astype(o_ref.dtype)


def prepare_params(w1, b1, w2, b2):
    """One-time weight formatting, hoisted out of the per-call path.

    w1: (IN, H), b1: (H,), w2: (H, OUT), b2: (OUT,) -- weights transposed
    relative to PyTorch nn.Linear.weight so the forward computes x @ W + b.
    """
    IN, H = w1.shape
    OUT = w2.shape[1]
    in_pad = _round_up(IN, LANE)
    out_pad = _round_up(max(OUT, LANE), LANE)

    w1_bf = jnp.zeros((in_pad, H), jnp.bfloat16).at[:IN, :].set(
        w1.astype(jnp.bfloat16))
    b1_f = b1.reshape(1, H).astype(jnp.float32)
    w2_bf = jnp.zeros((H, out_pad), jnp.bfloat16).at[:, :OUT].set(
        w2.astype(jnp.bfloat16))
    b2_f = jnp.zeros((1, out_pad), jnp.float32).at[0, :OUT].set(
        b2.reshape(-1).astype(jnp.float32))
    return {"w1": w1_bf, "b1": b1_f, "w2": w2_bf, "b2": b2_f,
            "in_features": IN, "out_features": OUT}


@functools.partial(jax.jit, static_argnames=("out_features",))
def _forward(x, w1_bf, b1_f, w2_bf, b2_f, *, out_features):
    B, IN = x.shape
    in_pad, H = w1_bf.shape
    out_pad = w2_bf.shape[1]

    # Per-call activation prep (fused by jit): cast to bf16, K-pad with zeros.
    x_bf = x.astype(jnp.bfloat16)
    if in_pad != IN:
        x_bf = jnp.pad(x_bf, ((0, 0), (0, in_pad - IN)))

    flops = 2 * B * (in_pad * H + H * out_pad)
    bytes_accessed = (x_bf.size * 2 + w1_bf.size * 2 + b1_f.size * 4
                      + w2_bf.size * 2 + b2_f.size * 4 + B * out_pad * 4)

    vmem_spec = pl.BlockSpec(memory_space=pltpu.MemorySpace.VMEM)
    y_pad = pl.pallas_call(
        mlp_kernel,
        out_shape=jax.ShapeDtypeStruct((B, out_pad), jnp.float32),
        in_specs=[vmem_spec] * 5,
        out_specs=vmem_spec,
        cost_estimate=pl.CostEstimate(
            flops=flops, transcendentals=0, bytes_accessed=bytes_accessed),
    )(x_bf, w1_bf, b1_f, w2_bf, b2_f)

    # Slice the padded lanes back to the logical output width (fused by jit).
    return y_pad[:, :out_features]


def simple_network(x, params):
    """x: (B, IN) f32; params: output of prepare_params()."""
    return _forward(x, params["w1"], params["b1"], params["w2"], params["b2"],
                    out_features=params["out_features"])


def reference_bf16(x, w1, b1, w2, b2):
    # Reference mimicking the kernel's bf16-operand / f32-accumulate numerics.
    xb = x.astype(jnp.bfloat16).astype(jnp.float32)
    w1b = w1.astype(jnp.bfloat16).astype(jnp.float32)
    w2b = w2.astype(jnp.bfloat16).astype(jnp.float32)
    h = jnp.maximum(xb @ w1b + b1.reshape(1, -1), 0.0)
    hb = h.astype(jnp.bfloat16).astype(jnp.float32)
    return hb @ w2b + b2.reshape(1, -1)


if __name__ == "__main__":
    # Shapes implied by the module: input_size=784, hidden_size=128,
    # output_size=10. Batch=16 (one full bf16 sublane tile, per review).
    B, IN, H, OUT = 16, 784, 128, 10

    key = jax.random.PRNGKey(0)
    kx, kw1, kb1, kw2, kb2 = jax.random.split(key, 5)

    x = jax.random.normal(kx, (B, IN), dtype=jnp.float32)

    # PyTorch-style uniform(-1/sqrt(fan_in), 1/sqrt(fan_in)) init.
    lim1 = 1.0 / jnp.sqrt(IN)
    lim2 = 1.0 / jnp.sqrt(H)
    w1 = jax.random.uniform(kw1, (IN, H), jnp.float32, -lim1, lim1)
    b1 = jax.random.uniform(kb1, (H,), jnp.float32, -lim1, lim1)
    w2 = jax.random.uniform(kw2, (H, OUT), jnp.float32, -lim2, lim2)
    b2 = jax.random.uniform(kb2, (OUT,), jnp.float32, -lim2, lim2)

    # One-time init cost (not in the per-call path).
    params = prepare_params(w1, b1, w2, b2)

    out = simple_network(x, params)
    jax.block_until_ready(out)

    ref = reference_bf16(x, w1, b1, w2, b2)
    assert out.shape == (B, OUT)
    assert jnp.allclose(out, ref, atol=2e-3, rtol=2e-3), (
        float(jnp.max(jnp.abs(out - ref))))

    print("KERNEL_OK")
</pallas_src>

<mosaic_0001>
module attributes {stable_mosaic.version = 11 : i64} {
  func.func @mlp_kernel(%arg0: memref<16x896xbf16, #tpu.memory_space<vmem>>, %arg1: memref<896x128xbf16, #tpu.memory_space<vmem>>, %arg2: memref<1x128xf32, #tpu.memory_space<vmem>>, %arg3: memref<128x128xbf16, #tpu.memory_space<vmem>>, %arg4: memref<1x128xf32, #tpu.memory_space<vmem>>, %arg5: memref<16x128xf32, #tpu.memory_space<vmem>>) attributes {dimension_semantics = [], scalar_prefetch = 0 : i64, scratch_operands = 0 : i64, tpu.core_type = #tpu.core_type<tc>} {
    %c0 = arith.constant 0 : index
    %c0_0 = arith.constant 0 : index
    %0 = vector.load %arg0[%c0, %c0_0] : memref<16x896xbf16, #tpu.memory_space<vmem>>, vector<16x896xbf16>
    %c0_1 = arith.constant 0 : index
    %c0_2 = arith.constant 0 : index
    %1 = vector.load %arg1[%c0_1, %c0_2] : memref<896x128xbf16, #tpu.memory_space<vmem>>, vector<896x128xbf16>
    %cst = arith.constant dense<0.000000e+00> : vector<16x128xf32>
    %2 = tpu.matmul %0, %1, %cst {dimension_numbers = #tpu.dot_dimension_numbers<[1], [0], [0], [1], [0, 0, 1, 1], [], []>} : vector<16x896xbf16>, vector<896x128xbf16>, vector<16x128xf32> -> vector<16x128xf32>
    %c0_3 = arith.constant 0 : index
    %c0_4 = arith.constant 0 : index
    %3 = vector.load %arg2[%c0_3, %c0_4] : memref<1x128xf32, #tpu.memory_space<vmem>>, vector<1x128xf32>
    %4 = vector.broadcast %3 : vector<1x128xf32> to vector<16x128xf32>
    %5 = arith.addf %2, %4 : vector<16x128xf32>
    %cst_5 = arith.constant 0.000000e+00 : f32
    %6 = vector.broadcast %cst_5 : f32 to vector<16x128xf32>
    %7 = arith.maximumf %5, %6 : vector<16x128xf32>
    %8 = arith.truncf %7 : vector<16x128xf32> to vector<16x128xbf16>
    %c0_6 = arith.constant 0 : index
    %c0_7 = arith.constant 0 : index
    %9 = vector.load %arg3[%c0_6, %c0_7] : memref<128x128xbf16, #tpu.memory_space<vmem>>, vector<128x128xbf16>
    %cst_8 = arith.constant dense<0.000000e+00> : vector<16x128xf32>
    %10 = tpu.matmul %8, %9, %cst_8 {dimension_numbers = #tpu.dot_dimension_numbers<[1], [0], [0], [1], [0, 0, 1, 1], [], []>} : vector<16x128xbf16>, vector<128x128xbf16>, vector<16x128xf32> -> vector<16x128xf32>
    %c0_9 = arith.constant 0 : index
    %c0_10 = arith.constant 0 : index
    %11 = vector.load %arg4[%c0_9, %c0_10] : memref<1x128xf32, #tpu.memory_space<vmem>>, vector<1x128xf32>
    %12 = vector.broadcast %11 : vector<1x128xf32> to vector<16x128xf32>
    %13 = arith.addf %10, %12 : vector<16x128xf32>
    %c0_11 = arith.constant 0 : index
    %c0_12 = arith.constant 0 : index
    %14 = vector.load %arg5[%c0_11, %c0_12] : memref<16x128xf32, #tpu.memory_space<vmem>>, vector<16x128xf32>
    tpu.vector_store %arg5[%c0_11, %c0_12], %13 {strides = array<i32>} : memref<16x128xf32, #tpu.memory_space<vmem>>, vector<16x128xf32>,
    return
  }
}

</mosaic_0001>

<bundles_post_ra>
// kernel: _forward.1
= control target key start
LH: loop header
LB: loop body
LE: loop exit
PB: predicated region body
PF: predicated region fallthrough
CT: control target
= control target key end

     0   :  { %10 = vsyncpa [#allocation3], 0  ;;  %s1271_s0 = inlined_call_operand.vmem [shape: bf16[16,896], index: 0, kind: input, shape index: {}]   ;;  %s1272_s1 = inlined_call_operand.hbm [shape: bf16[896,128], index: 1, kind: input, shape index: {}]   ;;  %s1273_s2 = inlined_call_operand.vmem [shape: f32[1,128], index: 2, kind: input, shape index: {}]   ;;  %s1274_s3 = inlined_call_operand.vmem [shape: bf16[128,128], index: 3, kind: input, shape index: {}]   ;;  %s1275_s4 = inlined_call_operand.vmem [shape: f32[1,128], index: 4, kind: input, shape index: {}]   ;;  %s1276_s5 = inlined_call_operand.hbm [shape: f32[16,128], index: 5, kind: output, shape index: {}]  }
   0x1   :  { %11 = vsyncpa [#allocation4], 0  ;;  %s1156_s18 = smov [#allocation2]  }
   0x2   :  { %s19_s19 = sshll.u32 %s1156_s18, 4  ;;  %s20_s19 = int_to_ptr.vmem [resolvable:$true] %s19_s19 }
   0x3   :  { %s1120_s20 = scalar_lea.vmem %s20_s19, 7168  ;;  %p1125_p1 = scmp.lt.s32.totalorder %s20_s19, %s20_s19 }
   0x4   :  { %p1121_p0 = scmp.ne.s32.totalorder %s20_s19, %s1120_s20  ;;  %p1126_p2 = scmp.lt.s32.totalorder %s1120_s20, %s1120_s20 }
   0x6   :  { %p1127_p3 = por %p1126_p2, %p1125_p1 }
   0x8   :  { %p1128_p4 = pnand %p1127_p3, %p1121_p0 }
   0xa   :  { %1131 = shalt.err (!%p1128_p4)
}
   0xb   :  { %s1157_s21 = smov 64   ;;  %s1158_s22 = smov 4  }
   0xc   :  { %25 = dma.hbm_to_vmem [thread:$0]  %s1272_s1, 7168, %s20_s19, [#allocation3], %s1157_s21, %s1157_s21, %s1158_s22  }
   0xd   :  { %1152 = dma.done.wait [#allocation3], 7168  }
   0xe   :  { %1153 = vsyncadd [#allocation3], 4294960128  ;;  %v1038_v0 = vld [vmem:[#allocation2 + $0x78] sm:$0xff]   ;;  %v1042_v4 = vld [vmem:[#allocation2 + $0x70] sm:$0xff]   ;;  %v1159_v36 = vmov 0.0   ;;  %vm1160_vm0 = vmmov 0  }
   0xf   :  { %v1039_v1 = vld [vmem:[#allocation2 + $0xf8] sm:$0xff]   ;;  %906 = vmatprep.subr.bf16.mxu0 %v1038_v0  ;;  %v1043_v5 = vld [vmem:[#allocation2 + $0xf0] sm:$0xff]   ;;  %v1046_v8 = vld [vmem:[#allocation2 + $0x68] sm:$0xff]   ;;  %s1161_s29 = smov [#allocation5]  }
  0x10   :  { %v1040_v2 = vld [vmem:[#allocation2 + $0x38] sm:$0xff]   ;;  %928 = vmatprep.subr.bf16.mxu1 %v1039_v1  ;;  %v1044_v6 = vld [vmem:[#allocation2 + $0x30] sm:$0xff]   ;;  %v1047_v9 = vld [vmem:[#allocation2 + $0xe8] sm:$0xff]   ;;  %s821_s30 = sshll.u32 %s1161_s29, 4  ;;  %s822_s30 = int_to_ptr.vmem [resolvable:$true] %s821_s30 }
  0x11   :  { %v1041_v3 = vld [vmem:[#allocation2 + $0xb8] sm:$0xff]   ;;  %907 = vmatpush3.bf16.msra.mxu0 %v1040_v2  ;;  %v1045_v7 = vld [vmem:[#allocation2 + $0xb0] sm:$0xff]   ;;  %v1048_v10 = vld [vmem:[#allocation2 + $0x28] sm:$0xff]   ;;  %s1132_s6 = scalar_lea.vmem %s822_s30, 256  ;;  %p1137_p6 = scmp.lt.s32.totalorder %s822_s30, %s822_s30 }
  0x12   :  { %929 = vmatpush3.bf16.msra.mxu1 %v1041_v3  ;;  %908 = vmatprep.subr.bf16.mxu0 %v1042_v4  ;;  %v1049_v11 = vld [vmem:[#allocation2 + $0xa8] sm:$0xff]   ;;  %v1050_v12 = vld [vmem:[#allocation2 + $0x60] sm:$0xff]   ;;  %v1054_v16 = vld [vmem:[#allocation2 + $0x58] sm:$0xff]   ;;  %p1133_p5 = scmp.ne.s32.totalorder %s822_s30, %s1132_s6  ;;  %p1138_p7 = scmp.lt.s32.totalorder %s1132_s6, %s1132_s6 }
  0x13   :  { %930 = vmatprep.subr.bf16.mxu1 %v1043_v5  ;;  %v1051_v13 = vld [vmem:[#allocation2 + $0xe0] sm:$0xff]   ;;  %v1055_v17 = vld [vmem:[#allocation2 + $0xd8] sm:$0xff]   ;;  %v1058_v20 = vld [vmem:[#allocation2 + $0x50] sm:$0xff]  }
  0x14   :  { %v1052_v14 = vld [vmem:[#allocation2 + $0x20] sm:$0xff]   ;;  %v1056_v18 = vld [vmem:[#allocation2 + $0x18] sm:$0xff]   ;;  %v1059_v21 = vld [vmem:[#allocation2 + $0xd0] sm:$0xff]   ;;  %p1139_p8 = por %p1138_p7, %p1137_p6 }
  0x15   :  { %909 = vmatpush3.bf16.msra.mxu0 %v1044_v6  ;;  %v1053_v15 = vld [vmem:[#allocation2 + $0xa0] sm:$0xff]   ;;  %v1057_v19 = vld [vmem:[#allocation2 + $0x98] sm:$0xff]   ;;  %v1060_v22 = vld [vmem:[#allocation2 + $0x10] sm:$0xff]  }
  0x16   :  { %931 = vmatpush3.bf16.msra.mxu1 %v1045_v7  ;;  %910 = vmatprep.subr.bf16.mxu0 %v1046_v8  ;;  %v1061_v23 = vld [vmem:[#allocation2 + $0x90] sm:$0xff]   ;;  %v1062_v24 = vld [vmem:[#allocation2 + $0x48] sm:$0xff]   ;;  %v1066_v28 = vld [vmem:[#allocation2 + $0x40] sm:$0xff]   ;;  %p1140_p9 = pnand %p1139_p8, %p1133_p5 }
  0x17   :  { %932 = vmatprep.subr.bf16.mxu1 %v1047_v9  ;;  %v1063_v25 = vld [vmem:[#allocation2 + $0xc8] sm:$0xff]   ;;  %v1067_v29 = vld [vmem:[#allocation2 + $0xc0] sm:$0xff]   ;;  %v1076_v37 = vld [vmem:[#allocation2 + $0x178] sm:$0xff]  }
  0x18   :  { %v1064_v26 = vld [vmem:[#allocation2 + $0x8] sm:$0xff]   ;;  %v1068_v30 = vld [vmem:[#allocation2] sm:$0xff]   ;;  %v1077_v38 = vld [vmem:[#allocation2 + $0x138] sm:$0xff]  }
  0x19   :  { %911 = vmatpush3.bf16.msra.mxu0 %v1048_v10  ;;  %v1065_v27 = vld [vmem:[#allocation2 + $0x88] sm:$0xff]   ;;  %v1069_v31 = vld [vmem:[#allocation2 + $0x80] sm:$0xff]   ;;  %v1078_v39 = vld [vmem:[#allocation2 + $0x1b8] sm:$0xff]  }
  0x1a   :  { %933 = vmatpush3.bf16.msra.mxu1 %v1049_v11  ;;  %912 = vmatprep.subr.bf16.mxu0 %v1050_v12  ;;  %v1070_v32 = vld [vmem:[%s1271_s0] ss:$28 sps:$4 sm:$0xff]   ;;  %v1073_v34 = vld [vmem:[%s1271_s0 + $0x8] ss:$28 sps:$4 sm:$0xff]   ;;  %v1079_v40 = vld [vmem:[#allocation2 + $0x170] sm:$0xff]  }
  0x1b   :  { %934 = vmatprep.subr.bf16.mxu1 %v1051_v13  ;;  %v1072_v33 = vld [vmem:[%s1271_s0 + $0x4] ss:$28 sps:$4 sm:$0xff]   ;;  %v1075_v35 = vld [vmem:[%s1271_s0 + $0xc] ss:$28 sps:$4 sm:$0xff]   ;;  %v1080_v41 = vld [vmem:[#allocation2 + $0x130] sm:$0xff]  }
  0x1c   :  { %567 = vmatprep.mubr.bf16.mxu0 %v1072_v33  ;;  %608 = vmatprep.mubr.bf16.mxu1 %v1075_v35  ;;  %v1081_v42 = vld [vmem:[#allocation2 + $0x1b0] sm:$0xff]   ;;  %v1082_v43 = vld [vmem:[#allocation2 + $0x168] sm:$0xff]   ;;  %v1085_v46 = vld [vmem:[#allocation2 + $0x160] sm:$0xff]  }
  0x1d   :  { %913 = vmatpush3.bf16.msra.mxu0 %v1052_v14  ;;  %v1083_v44 = vld [vmem:[#allocation2 + $0x128] sm:$0xff]   ;;  %v1086_v47 = vld [vmem:[#allocation2 + $0x120] sm:$0xff]   ;;  %v1088_v49 = vld [vmem:[#allocation2 + $0x158] sm:$0xff]  }
  0x1e   :  { %935 = vmatpush3.bf16.msra.mxu1 %v1053_v15  ;;  %914 = vmatprep.subr.bf16.mxu0 %v1054_v16  ;;  %v1084_v45 = vld [vmem:[#allocation2 + $0x1a8] sm:$0xff]   ;;  %v1087_v48 = vld [vmem:[#allocation2 + $0x1a0] sm:$0xff]   ;;  %v1089_v50 = vld [vmem:[#allocation2 + $0x118] sm:$0xff]  }
  0x1f   :  { %936 = vmatprep.subr.bf16.mxu1 %v1055_v17  ;;  %v1090_v51 = vld [vmem:[#allocation2 + $0x198] sm:$0xff]   ;;  %v1091_v52 = vld [vmem:[#allocation2 + $0x150] sm:$0xff]   ;;  %v1094_v55 = vld [vmem:[#allocation2 + $0x148] sm:$0xff]  }
  0x20   :  { %v1092_v53 = vld [vmem:[#allocation2 + $0x110] sm:$0xff]   ;;  %v1095_v56 = vld [vmem:[#allocation2 + $0x108] sm:$0xff]   ;;  %v1097_v58 = vld [vmem:[#allocation2 + $0x140] sm:$0xff]  }
  0x21   :  { %915 = vmatpush3.bf16.msra.mxu0 %v1056_v18  ;;  %v1093_v54 = vld [vmem:[#allocation2 + $0x190] sm:$0xff]   ;;  %v1096_v57 = vld [vmem:[#allocation2 + $0x188] sm:$0xff]   ;;  %v1098_v60 = vld [vmem:[#allocation2 + $0x100] sm:$0xff]  }
  0x22   :  { %937 = vmatpush3.bf16.msra.mxu1 %v1057_v19  ;;  %916 = vmatprep.subr.bf16.mxu0 %v1058_v20  ;;  %v1102_v59 = vld [vmem:[%s1271_s0 + $0x14] ss:$28 sps:$4 sm:$0xff]   ;;  %v1099_v61 = vld [vmem:[#allocation2 + $0x180] sm:$0xff]   ;;  %v1104_v0 = vld [vmem:[%s1274_s3 + $0x38] sm:$0xff]  }
  0x23   :  { %938 = vmatprep.subr.bf16.mxu1 %v1059_v21  ;;  %v1100_v62 = vld [vmem:[%s1271_s0 + $0x10] ss:$28 sps:$4 sm:$0xff]   ;;  %v1103_v63 = vld [vmem:[%s1271_s0 + $0x18] ss:$28 sps:$4 sm:$0xff]   ;;  %v1107_v3 = vld [vmem:[%s1274_s3 + $0x20] sm:$0xff]  }
  0x24   :  { %v1105_v1 = vld [vmem:[%s1274_s3 + $0x30] sm:$0xff]   ;;  %v1106_v2 = vld [vmem:[%s1274_s3 + $0x28] sm:$0xff]   ;;  %v1108_v4 = vld [vmem:[%s1274_s3 + $0x18] sm:$0xff]  }
  0x25   :  { %917 = vmatpush3.bf16.msra.mxu0 %v1060_v22  ;;  %v1109_v5 = vld [vmem:[%s1274_s3 + $0x10] sm:$0xff]   ;;  %v1110_v6 = vld [vmem:[%s1274_s3 + $0x8] sm:$0xff]   ;;  %v1111_v7 = vld [vmem:[%s1274_s3] sm:$0xff]  }
  0x26   :  { %939 = vmatpush3.bf16.msra.mxu1 %v1061_v23  ;;  %918 = vmatprep.subr.bf16.mxu0 %v1062_v24  ;;  %v833_v15 = vld [vmem:[%s1273_s2] ss:$0 sm:$0xff] }
  0x27   :  { %940 = vmatprep.subr.bf16.mxu1 %v1063_v25 }
  0x29   :  { %919 = vmatpush3.bf16.msra.mxu0 %v1064_v26 }
  0x2a   :  { %941 = vmatpush3.bf16.msra.mxu1 %v1065_v27  ;;  %920 = vmatprep.subr.bf16.mxu0 %v1066_v28 }
  0x2b   :  { %942 = vmatprep.subr.bf16.mxu1 %v1067_v29 }
  0x2d   :  { %921 = vmatpush3.bf16.msra.mxu0 %v1068_v30 }
  0x2e   :  { %943 = vmatpush3.bf16.msra.mxu1 %v1069_v31  ;;  %950 = vmatprep.subr.bf16.mxu0 %v1076_v37 }
  0x2f   :  { %990 = vmatprep.subr.bf16.mxu1 %v1159_v36 }
  0x30   :  { %568 = vmatmul.mubr.bf16.vlgmr.msra.gmra.mxu0 %v1070_v32 }
  0x31   :  { %609 = vmatmul.mubr.bf16.vlgmr.msra.gmra.mxu1 %v1073_v34  ;;  %951 = vmatpush3.bf16.msra.mxu0 %v1077_v38 }
  0x32   :  { %1006 = vmatprep.mubr.msk.bf16.mxu1 %vm1160_vm0, %v1159_v36  ;;  %991 = vmatpush3.bf16.msra.mxu1 %v1078_v39 }
  0x33   :  { %952 = vmatprep.subr.bf16.mxu0 %v1079_v40  ;;  %992 = vmatprep.subr.bf16.mxu1 %v1159_v36 }
  0x34   :  { %649 = vmatprep.mubr.bf16.mxu0 %v1102_v59 }
  0x35   :  { %953 = vmatpush3.bf16.msra.mxu0 %v1080_v41 }
  0x36   :  { %993 = vmatpush3.bf16.msra.mxu1 %v1081_v42  ;;  %954 = vmatprep.subr.bf16.mxu0 %v1082_v43  ;;  %v897_v42 = vld [vmem:[%s1275_s4] ss:$0 sm:$0xff] }
  0x37   :  { %994 = vmatprep.subr.bf16.mxu1 %v1159_v36 }
  0x39   :  { %955 = vmatpush3.bf16.msra.mxu0 %v1083_v44 }
  0x3a   :  { %995 = vmatpush3.bf16.msra.mxu1 %v1084_v45  ;;  %956 = vmatprep.subr.bf16.mxu0 %v1085_v46 }
  0x3b   :  { %996 = vmatprep.subr.bf16.mxu1 %v1159_v36 }
  0x3d   :  { %957 = vmatpush3.bf16.msra.mxu0 %v1086_v47 }
  0x3e   :  { %997 = vmatpush3.bf16.msra.mxu1 %v1087_v48  ;;  %958 = vmatprep.subr.bf16.mxu0 %v1088_v49 }
  0x3f   :  { %998 = vmatprep.subr.bf16.mxu1 %v1159_v36 }
  0x41   :  { %959 = vmatpush3.bf16.msra.mxu0 %v1089_v50 }
  0x42   :  { %999 = vmatpush3.bf16.msra.mxu1 %v1090_v51  ;;  %960 = vmatprep.subr.bf16.mxu0 %v1091_v52 }
  0x43   :  { %1000 = vmatprep.subr.bf16.mxu1 %v1159_v36 }
  0x45   :  { %961 = vmatpush3.bf16.msra.mxu0 %v1092_v53 }
  0x46   :  { %1001 = vmatpush3.bf16.msra.mxu1 %v1093_v54  ;;  %962 = vmatprep.subr.bf16.mxu0 %v1094_v55 }
  0x47   :  { %1002 = vmatprep.subr.bf16.mxu1 %v1159_v36 }
  0x49   :  { %963 = vmatpush3.bf16.msra.mxu0 %v1095_v56 }
  0x4a   :  { %1003 = vmatpush3.bf16.msra.mxu1 %v1096_v57  ;;  %964 = vmatprep.subr.bf16.mxu0 %v1097_v58 }
  0x4b   :  { %1004 = vmatprep.subr.bf16.mxu1 %v1159_v36 }
  0x4d   :  { %965 = vmatpush3.bf16.msra.mxu0 %v1098_v60 }
  0x4e   :  { %1005 = vmatpush3.bf16.msra.mxu1 %v1099_v61  ;;  %1010 = vmatprep.subr.bf16.mxu0 %v1159_v36 }
  0x50   :  { %650 = vmatmul.mubr.bf16.vlgmr.msra.gmra.mxu0 %v1100_v62 }
  0x51   :  { %1007 = vmatmul.mubr.bf16.vlgmr.msra.gmra.mxu1 %v1103_v63  ;;  %1026 = vmatprep.mubr.msk.bf16.mxu0 %vm1160_vm0, %v1159_v36 }
  0x52   :  { %1011 = vmatpush3.bf16.msra.mxu0 %v1104_v0 }
  0x53   :  { %1012 = vmatprep.subr.bf16.mxu0 %v1159_v36 }
  0x56   :  { %1013 = vmatpush3.bf16.msra.mxu0 %v1105_v1 }
  0x57   :  { %1014 = vmatprep.subr.bf16.mxu0 %v1159_v36 }
  0x5a   :  { %1015 = vmatpush3.bf16.msra.mxu0 %v1106_v2 }
  0x5b   :  { %1016 = vmatprep.subr.bf16.mxu0 %v1159_v36 }
  0x5e   :  { %1017 = vmatpush3.bf16.msra.mxu0 %v1107_v3 }
  0x5f   :  { %1018 = vmatprep.subr.bf16.mxu0 %v1159_v36 }
  0x62   :  { %1019 = vmatpush3.bf16.msra.mxu0 %v1108_v4 }
  0x63   :  { %1020 = vmatprep.subr.bf16.mxu0 %v1159_v36 }
  0x66   :  { %1021 = vmatpush3.bf16.msra.mxu0 %v1109_v5 }
  0x67   :  { %1022 = vmatprep.subr.bf16.mxu0 %v1159_v36 }
  0x6a   :  { %1023 = vmatpush3.bf16.msra.mxu0 %v1110_v6 }
  0x6b   :  { %1024 = vmatprep.subr.bf16.mxu0 %v1159_v36 }
  0x6e   :  { %1025 = vmatpush3.bf16.msra.mxu0 %v1111_v7 }
  0xf0   :  { %v922_v8 = vpop.f32.mrf.mxu0 }
  0xf1   :  { %v944_v9 = vpop.f32.mrf.mxu1 }
  0xf2   :  { %v923_v10 = vpop.f32.mrf.mxu0 }
  0xf3   :  { %v945_v11 = vpop.f32.mrf.mxu1  ;;  %v924_v13 = vadd.f32 %v923_v10, %v922_v8 }
  0xf4   :  { %v925_v12 = vpop.f32.mrf.mxu0  ;;  %v946_v18 = vadd.f32 %v945_v11, %v944_v9 }
  0xf5   :  { %v947_v14 = vpop.f32.mrf.mxu1  ;;  %v570_v17 = vadd.f32 %v924_v13, %v833_v15 }
  0xf6   :  { %v926_v16 = vpop.f32.mrf.mxu0 }
  0xf7   :  { %v927_v19 = vadd.f32 %v926_v16, %v925_v12  ;;  %v948_v20 = vpop.f32.mrf.mxu1  ;;  %v611_v24 = vadd.f32 %v946_v18, %v570_v17 }
  0xf8   :  { %v949_v26 = vadd.f32 %v948_v20, %v947_v14 }
  0xf9   :  { %v573_v25 = vadd.f32 %v927_v19, %v833_v15 }
  0xfb   :  { %v614_v33 = vadd.f32 %v949_v26, %v573_v25 }
 0x110   :  { %v966_v21 = vpop.f32.mrf.mxu0 }
 0x111   :  { %v692_v22 = vpop.f32.mrf.mxu1 }
 0x112   :  { %v967_v23 = vpop.f32.mrf.mxu0 }
 0x113   :  { %v968_v27 = vadd.f32 %v967_v23, %v966_v21  ;;  %v1008_v28 = vpop.f32.mrf.mxu1 }
 0x114   :  { %v969_v29 = vpop.f32.mrf.mxu0 }
 0x115   :  { %v652_v30 = vadd.f32 %v968_v27, %v611_v24  ;;  %v695_v31 = vpop.f32.mrf.mxu1 }
 0x116   :  { %v970_v32 = vpop.f32.mrf.mxu0 }
 0x117   :  { %v971_v34 = vadd.f32 %v970_v32, %v969_v29  ;;  %v1009_v35 = vpop.f32.mrf.mxu1  ;;  %v693_v36 = vadd.f32 %v692_v22, %v652_v30 }
 0x119   :  { %v655_v37 = vadd.f32 %v971_v34, %v614_v33  ;;  %v699_v39 = vmax.f32 %v693_v36, 0.0 }
 0x11b   :  { %v696_v38 = vadd.f32 %v695_v31, %v655_v37 }
 0x11d   :  { %v700_v40 = vmax.f32 %v696_v38, 0.0 }
 0x11f   :  { %v701_v41 = vpack.c.bf16 %v700_v40, %v699_v39 }
 0x121   :  { %1027 = vmatmul.mubr.bf16.vlgmr.msra.gmra.mxu0 %v701_v41 }
 0x1e1   :  { %v807_v43 = vpop.f32.mrf.mxu0 }
 0x1e2   :  { %v808_v44 = vadd.f32 %v897_v42, %v807_v43 }
 0x1e3   :  { %v1028_v45 = vpop.f32.mrf.mxu0 }
 0x1e4   :  { %814 = vst [vmem:[#allocation5] sm:$0xff] %v808_v44 }
 0x1e5   :  { %v810_v46 = vpop.f32.mrf.mxu0 }
 0x1e6   :  { %v811_v47 = vadd.f32 %v897_v42, %v810_v46 }
 0x1e7   :  { %v1029_v48 = vpop.f32.mrf.mxu0 }
 0x1e8   :  { %815 = vst [vmem:[#allocation5 + $0x8] sm:$0xff] %v811_v47 }
 0x1e9   :  { %1143 = shalt.err (!%p1140_p9)
}
 0x1ea   :  { %s1162_s7 = smov 128   ;;  %s1163_s4 = smov 8  }
 0x1eb   :  { %827 = dma.vmem_to_hbm [thread:$0]  %s822_s30, 256, %s1276_s5, [#allocation4], %s1162_s7, %s1162_s7, %s1163_s4  }
 0x1ec   :  { %1154 = dma.done.wait [#allocation4], 256  }
 0x1ed   :  { %1155 = vsyncadd [#allocation4], 4294967040 }
 0x1ee   :  { %831 = vsyncpa [#allocation3], 1 }
 0x1ef   :  { %832 = vsyncpa [#allocation4], 1 }

</bundles_post_ra>
